<compile_context>
chip_gen: v6e
topology: v6e:2x2x1
jax: 0.10.0
libtpu: 0.0.40
codegen_flags: <defaults>
</compile_context>

<pallas_src>
import functools

import jax
import jax.numpy as jnp
from jax.experimental import pallas as pl
from jax.experimental.pallas import tpu as pltpu


def _round_up(x, m):
    return (x + m - 1) // m * m


def _vmem_budget_bytes():
    """~75% of physical per-core VMEM (≈48 MiB on v7x, ≈96 MiB on v5e/v6e)."""
    cap = 64 * 1024 * 1024                      # conservative default (v7x/TC)
    try:
        info = pltpu.get_tpu_info()
        cap = int(getattr(info, "vmem_capacity_bytes", cap))
    except Exception:
        pass
    return int(cap * 3 // 4)


def _res2_kernel(x_ref, w_ref, g_ref, b_ref, o_ref, sp_ref, *,
                 T, B, Bp, kernel_size, padding, dilation, eps,
                 mxu_dtype, carry_dtype):
    """Per-branch body.

    x_ref/o_ref: (1, T*Bp, W) time-major chunk blocks; w_ref: (1, K*W, W)
    pre-transposed per-tap weights (mxu_dtype); g_ref/b_ref: (1, 1, W);
    sp_ref: ((T + 2*padding)*Bp, W) persistent carry scratch in carry_dtype.
    """
    i = pl.program_id(0)
    TBp = T * Bp
    pBp = padding * Bp
    W = o_ref.shape[-1]

    chunk = x_ref[0].astype(jnp.float32)                       # (T*Bp, W)

    @pl.when(i == 0)
    def _init():
        if padding > 0:                                        # zero pad rows once
            zeros = jnp.zeros((pBp, W), carry_dtype)
            sp_ref[0:pBp, :] = zeros
            sp_ref[pBp + TBp:pBp + TBp + pBp, :] = zeros
        sp_ref[pBp:pBp + TBp, :] = chunk.astype(carry_dtype)   # sp = chunk_0

    @pl.when(i != 0)
    def _residual():                                           # sp = sp + chunk_i
        acc = sp_ref[pBp:pBp + TBp, :].astype(jnp.float32) + chunk
        sp_ref[pBp:pBp + TBp, :] = acc.astype(carry_dtype)

    # Conv1d (stride=1) as K accumulating MXU matmuls: each shifted tap slice of
    # the aligned carry scratch feeds the MXU directly (no operand concat, no
    # extra VMEM pass).  All slice starts are static multiples of 8 (Bp % 8 == 0)
    # so the slices are sublane-aligned views.
    y = None
    for k in range(kernel_size):
        start = k * dilation * Bp                              # static, % 8 == 0
        tap = sp_ref[start:start + TBp, :].astype(mxu_dtype)   # no-op if carry==mxu
        w_k = w_ref[0, k * W:(k + 1) * W, :]                   # (W, W), mxu_dtype
        part = jnp.dot(tap, w_k, preferred_element_type=jnp.float32)
        y = part if y is None else y + part                    # (T*Bp, W) f32

    # ReLU then train-mode BatchNorm1d (per-channel stats over real batch*time,
    # biased variance), one-pass statistics in f32.  Padded fake batch rows are
    # exactly zero post-conv/ReLU, so the sums are unaffected and dividing by
    # the real count (T*B) is exact.
    # TODO(synk): verify in the bundle dump that Mosaic fuses the two row
    #             reductions into one traversal of r; otherwise hand-tile it.
    r = jnp.maximum(y, 0.0)
    inv_n = 1.0 / float(T * B)
    mean = jnp.sum(r, axis=0, keepdims=True) * inv_n           # (1, W)
    var = jnp.maximum(jnp.sum(r * r, axis=0, keepdims=True) * inv_n
                      - mean * mean, 0.0)
    bn_scale = jax.lax.rsqrt(var + eps) * g_ref[0].astype(jnp.float32)
    shift = b_ref[0].astype(jnp.float32) - mean * bn_scale     # folded affine
    bn = r * bn_scale + shift                                  # 2 VALU ops/elem

    o_ref[0] = bn.astype(o_ref.dtype)

    @pl.when(i + 1 < pl.num_programs(0))                       # carry sp
    def _carry():
        bn_carry = bn
        if Bp != B:
            # Keep fake (padded) batch rows exactly zero in the carry so the
            # per-channel shift cannot leak into the next branch's statistics.
            row_b = jax.lax.broadcasted_iota(jnp.int32, (TBp, 1), 0) % Bp
            bn_carry = jnp.where(row_b < B, bn_carry, 0.0)
        sp_ref[pBp:pBp + TBp, :] = bn_carry.astype(carry_dtype)


def res2conv1d_relu_bn(x, weight, gamma, beta, *, scale, kernel_size=1,
                       stride=1, padding=0, dilation=1, eps=1e-5,
                       mxu_dtype=jnp.bfloat16, carry_dtype=None):
    """x: (B, C, T); weight: (nums, W_out, W_in, K) (PyTorch Conv1d layout);
    gamma/beta: (nums, width).

    mxu_dtype: MXU input dtype — keep bf16 (f32 matmuls are multi-pass and
    several times slower, especially on v5e).  carry_dtype: dtype of the
    persistent cross-branch sp scratch; defaults to mxu_dtype (halves carry
    traffic / scratch, removes the tap cast; adds <= nums-1 extra roundings to
    the residual chain).  Pass jnp.float32 for bit-tight parity.
    """
    assert stride == 1, "only stride=1 supported"  # TODO(synk): stride != 1
    if carry_dtype is None:
        carry_dtype = mxu_dtype
    B, C, T = x.shape
    assert C % scale == 0
    width = C // scale
    nums = scale if scale == 1 else scale - 1
    t_out = T + 2 * padding - dilation * (kernel_size - 1)
    assert t_out == T, "residual additions require a length-preserving conv"

    # Sublane-align the batch packing so every conv-tap / pad slice of the carry
    # scratch starts on an 8-row boundary.
    Bp = _round_up(max(B, 1), 8)

    # Branch chunks in time-major 2-D layout: (nums, T*Bp, width).  The
    # pass-through chunk is sliced away BEFORE the transpose so it never moves.
    xb = (x.reshape(B, scale, width, T)[:, :nums]
          .transpose(1, 3, 0, 2))                               # (nums, T, B, W)
    if Bp != B:
        xb = jnp.pad(xb, ((0, 0), (0, 0), (0, Bp - B), (0, 0)))
    x_branches = xb.reshape(nums, T * Bp, width)
    # (nums, W_out, W_in, K) -> (nums, K*W_in, W_out), pre-cast for the MXU.
    w_fused = (weight.transpose(0, 3, 2, 1)
               .reshape(nums, kernel_size * width, width)
               .astype(mxu_dtype))
    g3 = gamma.reshape(nums, 1, width)
    b3 = beta.reshape(nums, 1, width)

    TBp = T * Bp
    KW = kernel_size * width

    # Per-branch working-set estimate used to size the scoped-VMEM request.
    xbytes = jnp.dtype(x.dtype).itemsize
    mbytes = jnp.dtype(mxu_dtype).itemsize
    cbytes = jnp.dtype(carry_dtype).itemsize
    est = (2 * 2 * TBp * width * xbytes            # dbl-buffered input + output
           + 2 * (KW + 2) * width * mbytes         # dbl-buffered weight/affine
           + (T + 2 * padding) * Bp * width * cbytes   # persistent sp carry
           + 2 * TBp * width * mbytes              # live tap casts for the MXU
           + 3 * TBp * width * 4)                  # y / r / bn f32 temporaries
    budget = _vmem_budget_bytes()                  # ~48 MiB v7x, ~96 MiB v5e/v6e
    vmem_limit = int(min(max(int(1.5 * est), 32 * 1024 * 1024), budget))
    # TODO(synk): if est exceeds the budget (very large B*T), switch to a
    #             T-tiled two-pass BatchNorm path instead of requesting more.

    grid_spec = pltpu.PrefetchScalarGridSpec(
        num_scalar_prefetch=0,
        grid=(nums,),
        in_specs=[
            pl.BlockSpec((1, TBp, width), lambda i: (i, 0, 0)),   # chunk i
            pl.BlockSpec((1, KW, width), lambda i: (i, 0, 0)),    # per-tap weights
            pl.BlockSpec((1, 1, width), lambda i: (i, 0, 0)),     # gamma i
            pl.BlockSpec((1, 1, width), lambda i: (i, 0, 0)),     # beta i
        ],
        out_specs=pl.BlockSpec((1, TBp, width), lambda i: (i, 0, 0)),
        scratch_shapes=[pltpu.VMEM(((T + 2 * padding) * Bp, width), carry_dtype)],
    )

    kernel = functools.partial(
        _res2_kernel, T=T, B=B, Bp=Bp, kernel_size=kernel_size, padding=padding,
        dilation=dilation, eps=eps, mxu_dtype=mxu_dtype, carry_dtype=carry_dtype)

    out_branches = pl.pallas_call(
        kernel,
        out_shape=jax.ShapeDtypeStruct((nums, TBp, width), x.dtype),
        grid_spec=grid_spec,
        compiler_params=pltpu.CompilerParams(
            dimension_semantics=("arbitrary",),   # sequential chain via sp carry
            vmem_limit_bytes=vmem_limit),
    )(x_branches, w_fused, g3, b3)

    # (nums, T*Bp, width) -> (B, nums*width, T), dropping padded batch rows.
    out_main = (out_branches.reshape(nums, T, Bp, width)[:, :, :B, :]
                .transpose(2, 0, 3, 1)
                .reshape(B, nums * width, T))
    if scale == 1:
        return out_main
    # Pass-through chunk never went through the kernel: concatenate it back.
    return jnp.concatenate([out_main, x[:, nums * width:, :]], axis=1)


def reference(x, weight, gamma, beta, *, scale, kernel_size, padding, dilation,
              eps=1e-5, conv_dtype=jnp.float32, carry_dtype=jnp.float32):
    """Pure-JAX reference mirroring the PyTorch module (train-mode BN).
    conv_dtype emulates the MXU input dtype; carry_dtype emulates the kernel's
    cross-branch carry precision (f32 == the exact PyTorch residual chain)."""
    B, C, T = x.shape
    width = C // scale
    nums = scale if scale == 1 else scale - 1
    chunks = [x[:, i * width:(i + 1) * width, :].astype(jnp.float32)
              for i in range(scale)]
    out = []
    sp = None
    for i in range(nums):
        sp = chunks[i] if i == 0 else sp + chunks[i]
        y = jax.lax.conv_general_dilated(
            sp.astype(conv_dtype), weight[i].astype(conv_dtype),
            window_strides=(1,), padding=[(padding, padding)],
            rhs_dilation=(dilation,), dimension_numbers=("NCH", "OIH", "NCH"),
            preferred_element_type=jnp.float32)
        r = jnp.maximum(y, 0.0)
        mean = jnp.mean(r, axis=(0, 2), keepdims=True)
        var = jnp.mean((r - mean) ** 2, axis=(0, 2), keepdims=True)
        bn = ((r - mean) / jnp.sqrt(var + eps) * gamma[i][None, :, None]
              + beta[i][None, :, None])
        out.append(bn)
        # Emulate the kernel's carry-precision rounding between branches.
        sp = bn.astype(carry_dtype).astype(jnp.float32)
    if scale != 1:
        out.append(chunks[nums])
    return jnp.concatenate(out, axis=1).astype(x.dtype)


if __name__ == "__main__":
    B, channels, T, scale = 2, 32, 16, 4
    width = channels // scale
    nums = scale if scale == 1 else scale - 1

    key = jax.random.PRNGKey(0)
    kx, kw1, kw3, kg, kb = jax.random.split(key, 5)
    x = jax.random.normal(kx, (B, channels, T), jnp.float32)
    gamma = 1.0 + 0.1 * jax.random.normal(kg, (nums, width), jnp.float32)
    beta = 0.1 * jax.random.normal(kb, (nums, width), jnp.float32)

    configs = [
        # (kernel_size, padding, dilation, weight_key) -- defaults + ECAPA-style
        (1, 0, 1, kw1),
        (3, 1, 1, kw3),
    ]
    # (mxu_dtype, carry_dtype, tolerance).  The bf16-carry config allows a bit
    # more slack: the extra residual-chain roundings can flip a bf16 carry value
    # by one ulp relative to the (independently rounded) reference chain.
    numeric_cfgs = [
        (jnp.float32, jnp.float32, 1e-3),
        (jnp.bfloat16, jnp.float32, 1e-2),
        (jnp.bfloat16, jnp.bfloat16, 2e-2),
    ]

    for ks, pad, dil, wkey in configs:
        weight = 0.3 * jax.random.normal(wkey, (nums, width, width, ks),
                                         jnp.float32)
        for mxu_dtype, carry_dtype, tol in numeric_cfgs:
            out = res2conv1d_relu_bn(x, weight, gamma, beta, scale=scale,
                                     kernel_size=ks, padding=pad, dilation=dil,
                                     mxu_dtype=mxu_dtype, carry_dtype=carry_dtype)
            out = jax.block_until_ready(out)
            ref = reference(x, weight, gamma, beta, scale=scale, kernel_size=ks,
                            padding=pad, dilation=dil, conv_dtype=mxu_dtype,
                            carry_dtype=carry_dtype)
            assert out.shape == (B, channels, T)
            err = float(jnp.max(jnp.abs(out - ref)))
            if err > tol:
                raise AssertionError(
                    f"mismatch vs reference (k={ks}, "
                    f"mxu={jnp.dtype(mxu_dtype).name}, "
                    f"carry={jnp.dtype(carry_dtype).name}): max err {err}")

    print("KERNEL_OK")
</pallas_src>

<mosaic_0001>
module attributes {stable_mosaic.version = 11 : i64} {
  func.func @_res2_kernel(%arg0: i32, %arg1: memref<1x128x8xf32, #tpu.memory_space<vmem>>, %arg2: memref<1x8x8xf32, #tpu.memory_space<vmem>>, %arg3: memref<1x1x8xf32, #tpu.memory_space<vmem>>, %arg4: memref<1x1x8xf32, #tpu.memory_space<vmem>>, %arg5: memref<1x128x8xf32, #tpu.memory_space<vmem>>, %arg6: memref<128x8xf32, #tpu.memory_space<vmem>>) attributes {dimension_semantics = [#tpu.dimension_semantics<arbitrary>], iteration_bounds = array<i64: 3>, scalar_prefetch = 0 : i64, scratch_operands = 1 : i64, tpu.core_type = #tpu.core_type<tc>, window_params = [{transform_indices = @transform_0, window_bounds = array<i64: 1, 128, 8>}, {transform_indices = @transform_1, window_bounds = array<i64: 1, 8, 8>}, {transform_indices = @transform_2, window_bounds = array<i64: 1, 1, 8>}, {transform_indices = @transform_3, window_bounds = array<i64: 1, 1, 8>}, {transform_indices = @transform_4, window_bounds = array<i64: 1, 128, 8>}]} {
    %c0 = arith.constant 0 : index
    %c0_0 = arith.constant 0 : index
    %c0_1 = arith.constant 0 : index
    %0 = vector.load %arg1[%c0, %c0_0, %c0_1] : memref<1x128x8xf32, #tpu.memory_space<vmem>>, vector<1x128x8xf32>
    %1 = vector.shape_cast %0 : vector<1x128x8xf32> to vector<128x8xf32>
    %c0_i32 = arith.constant 0 : i32
    %2 = arith.cmpi eq, %arg0, %c0_i32 : i32
    %3 = arith.extui %2 : i1 to i32
    %c0_i32_2 = arith.constant 0 : i32
    %4 = arith.cmpi ne, %3, %c0_i32_2 : i32
    scf.if %4 {
      %c0_27 = arith.constant 0 : index
      %c0_28 = arith.constant 0 : index
      %48 = vector.load %arg6[%c0_27, %c0_28] : memref<128x8xf32, #tpu.memory_space<vmem>>, vector<128x8xf32>
      tpu.vector_store %arg6[%c0_27, %c0_28], %1 {strides = array<i32>} : memref<128x8xf32, #tpu.memory_space<vmem>>, vector<128x8xf32>,
    } else {
    }
    %c0_i32_3 = arith.constant 0 : i32
    %5 = arith.cmpi ne, %arg0, %c0_i32_3 : i32
    %6 = arith.extui %5 : i1 to i32
    %c0_i32_4 = arith.constant 0 : i32
    %7 = arith.cmpi ne, %6, %c0_i32_4 : i32
    scf.if %7 {
      %c0_27 = arith.constant 0 : index
      %c0_28 = arith.constant 0 : index
      %48 = vector.load %arg6[%c0_27, %c0_28] : memref<128x8xf32, #tpu.memory_space<vmem>>, vector<128x8xf32>
      %49 = arith.addf %48, %1 : vector<128x8xf32>
      %c0_29 = arith.constant 0 : index
      %c0_30 = arith.constant 0 : index
      %50 = vector.load %arg6[%c0_29, %c0_30] : memref<128x8xf32, #tpu.memory_space<vmem>>, vector<128x8xf32>
      tpu.vector_store %arg6[%c0_29, %c0_30], %49 {strides = array<i32>} : memref<128x8xf32, #tpu.memory_space<vmem>>, vector<128x8xf32>,
    } else {
    }
    %c0_5 = arith.constant 0 : index
    %c0_6 = arith.constant 0 : index
    %8 = vector.load %arg6[%c0_5, %c0_6] : memref<128x8xf32, #tpu.memory_space<vmem>>, vector<128x8xf32>
    %c0_7 = arith.constant 0 : index
    %c0_8 = arith.constant 0 : index
    %c0_9 = arith.constant 0 : index
    %9 = vector.load %arg2[%c0_7, %c0_8, %c0_9] : memref<1x8x8xf32, #tpu.memory_space<vmem>>, vector<1x8x8xf32>
    %10 = vector.shape_cast %9 : vector<1x8x8xf32> to vector<8x8xf32>
    %cst = arith.constant dense<0.000000e+00> : vector<128x8xf32>
    %11 = tpu.matmul %8, %10, %cst {dimension_numbers = #tpu.dot_dimension_numbers<[1], [0], [0], [1], [0, 0, 1, 1], [], []>} : vector<128x8xf32>, vector<8x8xf32>, vector<128x8xf32> -> vector<128x8xf32>
    %cst_10 = arith.constant 0.000000e+00 : f32
    %12 = vector.broadcast %cst_10 : f32 to vector<128x8xf32>
    %13 = arith.maximumf %11, %12 : vector<128x8xf32>
    %cst_11 = arith.constant dense<0.000000e+00> : vector<8xf32>
    %14 = vector.multi_reduction <add>, %13, %cst_11 [0] : vector<128x8xf32> to vector<8xf32>
    %15 = vector.shape_cast %14 : vector<8xf32> to vector<1x8xf32>
    %cst_12 = arith.constant 3.125000e-02 : f32
    %16 = vector.broadcast %cst_12 : f32 to vector<1x8xf32>
    %17 = arith.mulf %15, %16 : vector<1x8xf32>
    %18 = arith.mulf %13, %13 : vector<128x8xf32>
    %cst_13 = arith.constant dense<0.000000e+00> : vector<8xf32>
    %19 = vector.multi_reduction <add>, %18, %cst_13 [0] : vector<128x8xf32> to vector<8xf32>
    %20 = vector.shape_cast %19 : vector<8xf32> to vector<1x8xf32>
    %cst_14 = arith.constant 3.125000e-02 : f32
    %21 = vector.broadcast %cst_14 : f32 to vector<1x8xf32>
    %22 = arith.mulf %20, %21 : vector<1x8xf32>
    %23 = arith.mulf %17, %17 : vector<1x8xf32>
    %24 = arith.subf %22, %23 : vector<1x8xf32>
    %cst_15 = arith.constant 0.000000e+00 : f32
    %25 = vector.broadcast %cst_15 : f32 to vector<1x8xf32>
    %26 = arith.maximumf %24, %25 : vector<1x8xf32>
    %cst_16 = arith.constant 9.99999974E-6 : f32
    %27 = vector.broadcast %cst_16 : f32 to vector<1x8xf32>
    %28 = arith.addf %26, %27 : vector<1x8xf32>
    %29 = math.rsqrt %28 : vector<1x8xf32>
    %c0_17 = arith.constant 0 : index
    %c0_18 = arith.constant 0 : index
    %c0_19 = arith.constant 0 : index
    %30 = vector.load %arg3[%c0_17, %c0_18, %c0_19] : memref<1x1x8xf32, #tpu.memory_space<vmem>>, vector<1x1x8xf32>
    %31 = vector.shape_cast %30 : vector<1x1x8xf32> to vector<1x8xf32>
    %32 = arith.mulf %29, %31 : vector<1x8xf32>
    %c0_20 = arith.constant 0 : index
    %c0_21 = arith.constant 0 : index
    %c0_22 = arith.constant 0 : index
    %33 = vector.load %arg4[%c0_20, %c0_21, %c0_22] : memref<1x1x8xf32, #tpu.memory_space<vmem>>, vector<1x1x8xf32>
    %34 = vector.shape_cast %33 : vector<1x1x8xf32> to vector<1x8xf32>
    %35 = arith.mulf %17, %32 : vector<1x8xf32>
    %36 = arith.subf %34, %35 : vector<1x8xf32>
    %37 = vector.broadcast %32 : vector<1x8xf32> to vector<128x8xf32>
    %38 = arith.mulf %13, %37 : vector<128x8xf32>
    %39 = vector.broadcast %36 : vector<1x8xf32> to vector<128x8xf32>
    %40 = arith.addf %38, %39 : vector<128x8xf32>
    %c0_23 = arith.constant 0 : index
    %c0_24 = arith.constant 0 : index
    %c0_25 = arith.constant 0 : index
    %41 = vector.load %arg5[%c0_23, %c0_24, %c0_25] : memref<1x128x8xf32, #tpu.memory_space<vmem>>, vector<1x128x8xf32>
    %42 = vector.shape_cast %41 : vector<1x128x8xf32> to vector<128x8xf32>
    %43 = vector.shape_cast %40 : vector<128x8xf32> to vector<1x128x8xf32>
    tpu.vector_store %arg5[%c0_23, %c0_24, %c0_25], %43 {strides = array<i32>} : memref<1x128x8xf32, #tpu.memory_space<vmem>>, vector<1x128x8xf32>,
    %c1_i32 = arith.constant 1 : i32
    %44 = arith.addi %arg0, %c1_i32 : i32
    %c3_i32 = arith.constant 3 : i32
    %45 = arith.cmpi slt, %44, %c3_i32 : i32
    %46 = arith.extui %45 : i1 to i32
    %c0_i32_26 = arith.constant 0 : i32
    %47 = arith.cmpi ne, %46, %c0_i32_26 : i32
    scf.if %47 {
      %48 = tpu.iota {dimensions = array<i32: 0>} : vector<128x1xi32>
      %c8_i32 = arith.constant 8 : i32
      %c0_i32_27 = arith.constant 0 : i32
      %49 = arith.cmpi eq, %c8_i32, %c0_i32_27 : i32
      %c1_i32_28 = arith.constant 1 : i32
      %50 = arith.select %49, %c1_i32_28, %c8_i32 : i32
      %51 = vector.broadcast %50 : i32 to vector<128x1xi32>
      %52 = arith.remsi %48, %51 : vector<128x1xi32>
      %c0_i32_29 = arith.constant 0 : i32
      %53 = vector.broadcast %c0_i32_29 : i32 to vector<128x1xi32>
      %54 = arith.cmpi ne, %52, %53 : vector<128x1xi32>
      %c0_i32_30 = arith.constant 0 : i32
      %55 = vector.broadcast %c0_i32_30 : i32 to vector<128x1xi32>
      %56 = arith.cmpi slt, %52, %55 : vector<128x1xi32>
      %c0_i32_31 = arith.constant 0 : i32
      %57 = arith.cmpi slt, %50, %c0_i32_31 : i32
      %58 = vector.broadcast %57 : i1 to vector<128x1xi1>
      %59 = vector.broadcast %58 : vector<128x1xi1> to vector<128x1xi1>
      %60 = arith.xori %56, %59 : vector<128x1xi1>
      %61 = arith.andi %60, %54 : vector<128x1xi1>
      %62 = vector.broadcast %50 : i32 to vector<128x1xi32>
      %63 = arith.addi %52, %62 : vector<128x1xi32>
      %64 = arith.select %61, %63, %52 : vector<128x1xi1>, vector<128x1xi32>
      %c2_i32 = arith.constant 2 : i32
      %65 = vector.broadcast %c2_i32 : i32 to vector<128x1xi32>
      %66 = arith.cmpi slt, %64, %65 : vector<128x1xi32>
      %cst_32 = arith.constant 0.000000e+00 : f32
      %67 = vector.shape_cast %66 : vector<128x1xi1> to vector<128x1xi1>
      %68 = vector.broadcast %67 : vector<128x1xi1> to vector<128x8xi1>
      %69 = vector.broadcast %cst_32 : f32 to vector<128x8xf32>
      %70 = arith.select %68, %40, %69 : vector<128x8xi1>, vector<128x8xf32>
      %c0_33 = arith.constant 0 : index
      %c0_34 = arith.constant 0 : index
      %71 = vector.load %arg6[%c0_33, %c0_34] : memref<128x8xf32, #tpu.memory_space<vmem>>, vector<128x8xf32>
      tpu.vector_store %arg6[%c0_33, %c0_34], %70 {strides = array<i32>} : memref<128x8xf32, #tpu.memory_space<vmem>>, vector<128x8xf32>,
    } else {
    }
    return
  }
  func.func @transform_0(%arg0: i32) -> (i32, i32, i32) {
    %c0_i32 = arith.constant 0 : i32
    %c0_i32_0 = arith.constant 0 : i32
    %c0_i32_1 = arith.constant 0 : i32
    return %arg0, %c0_i32, %c0_i32_0 : i32, i32, i32
  }
  func.func @transform_1(%arg0: i32) -> (i32, i32, i32) {
    %c0_i32 = arith.constant 0 : i32
    %c0_i32_0 = arith.constant 0 : i32
    %c0_i32_1 = arith.constant 0 : i32
    return %arg0, %c0_i32, %c0_i32_0 : i32, i32, i32
  }
  func.func @transform_2(%arg0: i32) -> (i32, i32, i32) {
    %c0_i32 = arith.constant 0 : i32
    %c0_i32_0 = arith.constant 0 : i32
    %c0_i32_1 = arith.constant 0 : i32
    return %arg0, %c0_i32, %c0_i32_0 : i32, i32, i32
  }
  func.func @transform_3(%arg0: i32) -> (i32, i32, i32) {
    %c0_i32 = arith.constant 0 : i32
    %c0_i32_0 = arith.constant 0 : i32
    %c0_i32_1 = arith.constant 0 : i32
    return %arg0, %c0_i32, %c0_i32_0 : i32, i32, i32
  }
  func.func @transform_4(%arg0: i32) -> (i32, i32, i32) {
    %c0_i32 = arith.constant 0 : i32
    %c0_i32_0 = arith.constant 0 : i32
    %c0_i32_1 = arith.constant 0 : i32
    return %arg0, %c0_i32, %c0_i32_0 : i32, i32, i32
  }
}

</mosaic_0001>

<bundles_post_ra>
// kernel: tpu_custom_call.1
= control target key start
LH: loop header
LB: loop body
LE: loop exit
PB: predicated region body
PF: predicated region fallthrough
CT: control target
= control target key end

     0   :  { %s1220_s15 = smov 0   ;;  %s1583_s0 = inlined_call_operand.vmem [shape: f32[3,128,8], index: 0, kind: input, shape index: {}]   ;;  %s1584_s1 = inlined_call_operand.vmem [shape: f32[3,8,8], index: 1, kind: input, shape index: {}]   ;;  %s1585_s2 = inlined_call_operand.vmem [shape: f32[3,1,8], index: 2, kind: input, shape index: {}]   ;;  %s1586_s3 = inlined_call_operand.vmem [shape: f32[3,1,8], index: 3, kind: input, shape index: {}]   ;;  %s1587_s4 = inlined_call_operand.vmem [shape: f32[3,128,8], index: 4, kind: output, shape index: {}]  }
   0x1 LB: > { %s1226_s16 = sadd.s32 4294967295, %s1193_s15   ;;  %p1103_p0 = scmp.ge.s32.totalorder %s1193_s15, 1  ;;  %s1193_s15 = sphi %s1220_s15, %s14_s15  }
   0x2   : > { %p187_p1 = scmp.lt.s32.totalorder %s1193_s15, 4 }
   0x4   : > { %p188_p2 = pnand %p1103_p0, %p187_p1 }
   0x5   : > { %p223_p3 = scmp.lt.s32.totalorder (!%p188_p2), %s1226_s16, 2  ;;  %p1109_p4 = scmp.ne.s32.totalorder (!%p188_p2), %s1226_s16, 0 }
   0x6   : > { %191 = sbr.rel (%p188_p2) target bundleno = 355 (0x163), region = 36 }
   0xb   : > { %s1232_s17 = scalar_select %p223_p3, %s1226_s16, 2 }
   0xd   : > { %s1130_s18 = sshll.u32 %s1232_s17, 7  ;;  %s1106_s19 = sshll.u32 %s1232_s17, 3 }
   0xe   : > { %s227_s22 = scalar_lea.vmem %s1583_s0, %s1130_s18  ;;  %s1242_s25 = scalar_lea.vmem %s1584_s1, %s1106_s19 }
   0xf   : > { %s234_s28 = scalar_lea.vmem %s1585_s2, %s1232_s17  ;;  %s237_s5 = scalar_lea.vmem %s1586_s3, %s1232_s17  ;;  %v243_v0 = vld [vmem:[%s227_s22] sm:$0xff]  ;;  %v244_v1 = vld [vmem:[%s227_s22 + $0x8] sm:$0xff]  ;;  %v245_v2 = vld [vmem:[%s227_s22 + $0x10] sm:$0xff] }
  0x10   : > { %s1255_s8 = scalar_lea.vmem %s1587_s4, %s1130_s18  ;;  %v246_v3 = vld [vmem:[%s227_s22 + $0x18] sm:$0xff]  ;;  %v247_v4 = vld [vmem:[%s227_s22 + $0x20] sm:$0xff]  ;;  %v248_v5 = vld [vmem:[%s227_s22 + $0x28] sm:$0xff]  ;;  %262 = sbr.rel (%p1109_p4) target bundleno = 30 (0x1e), region = 40 }
  0x11   : > { %v249_v6 = vld [vmem:[%s227_s22 + $0x30] sm:$0xff]  ;;  %v250_v7 = vld [vmem:[%s227_s22 + $0x38] sm:$0xff]  ;;  %v251_v8 = vld [vmem:[%s227_s22 + $0x40] sm:$0xff] }
  0x12   : > { %v252_v9 = vld [vmem:[%s227_s22 + $0x48] sm:$0xff]  ;;  %v253_v10 = vld [vmem:[%s227_s22 + $0x50] sm:$0xff]  ;;  %v254_v11 = vld [vmem:[%s227_s22 + $0x58] sm:$0xff] }
  0x13   : > { %v1257_v12 = vld [vmem:[%s227_s22 + $0x60] sm:$0xff]  ;;  %v1259_v13 = vld [vmem:[%s227_s22 + $0x68] sm:$0xff]  ;;  %v1261_v14 = vld [vmem:[%s227_s22 + $0x70] sm:$0xff] }
  0x14   : > { %v1263_v15 = vld [vmem:[%s227_s22 + $0x78] sm:$0xff] }
  0x15   : > { %vm263_vm0 = vcmask 64512  }
  0x16   : > { %264 = vst.msk [vmem:[#allocation2] sm:$0xff] %vm263_vm0, %v243_v0  ;;  %265 = vst.msk [vmem:[#allocation2 + $0x8] sm:$0xff] %vm263_vm0, %v244_v1 }
  0x17   : > { %266 = vst.msk [vmem:[#allocation2 + $0x10] sm:$0xff] %vm263_vm0, %v245_v2  ;;  %267 = vst.msk [vmem:[#allocation2 + $0x18] sm:$0xff] %vm263_vm0, %v246_v3 }
  0x18   : > { %268 = vst.msk [vmem:[#allocation2 + $0x20] sm:$0xff] %vm263_vm0, %v247_v4  ;;  %269 = vst.msk [vmem:[#allocation2 + $0x28] sm:$0xff] %vm263_vm0, %v248_v5 }
  0x19   : > { %270 = vst.msk [vmem:[#allocation2 + $0x30] sm:$0xff] %vm263_vm0, %v249_v6  ;;  %271 = vst.msk [vmem:[#allocation2 + $0x38] sm:$0xff] %vm263_vm0, %v250_v7 }
  0x1a   : > { %272 = vst.msk [vmem:[#allocation2 + $0x40] sm:$0xff] %vm263_vm0, %v251_v8  ;;  %273 = vst.msk [vmem:[#allocation2 + $0x48] sm:$0xff] %vm263_vm0, %v252_v9 }
  0x1b   : > { %274 = vst.msk [vmem:[#allocation2 + $0x50] sm:$0xff] %vm263_vm0, %v253_v10  ;;  %275 = vst.msk [vmem:[#allocation2 + $0x58] sm:$0xff] %vm263_vm0, %v254_v11 }
  0x1c   : > { %276 = vst.msk [vmem:[#allocation2 + $0x60] sm:$0xff] %vm263_vm0, %v1257_v12  ;;  %277 = vst.msk [vmem:[#allocation2 + $0x68] sm:$0xff] %vm263_vm0, %v1259_v13 }
  0x1d   : > { %278 = vst.msk [vmem:[#allocation2 + $0x70] sm:$0xff] %vm263_vm0, %v1261_v14  ;;  %279 = vst.msk [vmem:[#allocation2 + $0x78] sm:$0xff] %vm263_vm0, %v1263_v15 }
  0x1e PF: > { %p1110_p5 = scmp.eq.s32.totalorder %s1226_s16, 0 }
  0x20   : > { %283 = sbr.rel (%p1110_p5) target bundleno = 48 (0x30), region = 44 }
  0x25   : > { %v284_v16 = vld [vmem:[#allocation2] sm:$0xff]  ;;  %vm316_vm1 = vcmask 64512   ;;  %v285_v17 = vld [vmem:[#allocation2 + $0x8] sm:$0xff]  ;;  %v286_v18 = vld [vmem:[#allocation2 + $0x10] sm:$0xff] }
  0x26   : > { %v300_v19 = vadd.f32 %v284_v16, %v243_v0  ;;  %v301_v20 = vadd.f32 %v285_v17, %v244_v1  ;;  %v302_v21 = vadd.f32 %v286_v18, %v245_v2  ;;  %v287_v22 = vld [vmem:[#allocation2 + $0x18] sm:$0xff]  ;;  %v288_v23 = vld [vmem:[#allocation2 + $0x20] sm:$0xff]  ;;  %v289_v24 = vld [vmem:[#allocation2 + $0x28] sm:$0xff] }
  0x27   : > { %v303_v25 = vadd.f32 %v287_v22, %v246_v3  ;;  %v304_v26 = vadd.f32 %v288_v23, %v247_v4  ;;  %v305_v27 = vadd.f32 %v289_v24, %v248_v5  ;;  %v290_v28 = vld [vmem:[#allocation2 + $0x30] sm:$0xff]  ;;  %v291_v29 = vld [vmem:[#allocation2 + $0x38] sm:$0xff]  ;;  %v292_v30 = vld [vmem:[#allocation2 + $0x40] sm:$0xff] }
  0x28   : > { %317 = vst.msk [vmem:[#allocation2] sm:$0xff] %vm316_vm1, %v300_v19  ;;  %318 = vst.msk [vmem:[#allocation2 + $0x8] sm:$0xff] %vm316_vm1, %v301_v20  ;;  %v306_v31 = vadd.f32 %v290_v28, %v249_v6  ;;  %v307_v32 = vadd.f32 %v291_v29, %v250_v7  ;;  %v308_v33 = vadd.f32 %v292_v30, %v251_v8  ;;  %v293_v34 = vld [vmem:[#allocation2 + $0x48] sm:$0xff]  ;;  %v294_v35 = vld [vmem:[#allocation2 + $0x50] sm:$0xff] }
  0x29   : > { %319 = vst.msk [vmem:[#allocation2 + $0x10] sm:$0xff] %vm316_vm1, %v302_v21  ;;  %v295_v36 = vld [vmem:[#allocation2 + $0x58] sm:$0xff]  ;;  %320 = vst.msk [vmem:[#allocation2 + $0x18] sm:$0xff] %vm316_vm1, %v303_v25  ;;  %v309_v37 = vadd.f32 %v293_v34, %v252_v9  ;;  %v310_v38 = vadd.f32 %v294_v35, %v253_v10  ;;  %v296_v40 = vld [vmem:[#allocation2 + $0x60] sm:$0xff] }
  0x2a   : > { %321 = vst.msk [vmem:[#allocation2 + $0x20] sm:$0xff] %vm316_vm1, %v304_v26  ;;  %322 = vst.msk [vmem:[#allocation2 + $0x28] sm:$0xff] %vm316_vm1, %v305_v27  ;;  %v311_v39 = vadd.f32 %v295_v36, %v254_v11  ;;  %v297_v41 = vld [vmem:[#allocation2 + $0x68] sm:$0xff]  ;;  %v298_v42 = vld [vmem:[#allocation2 + $0x70] sm:$0xff]  ;;  %v312_v43 = vadd.f32 %v296_v40, %v1257_v12 }
  0x2b   : > { %323 = vst.msk [vmem:[#allocation2 + $0x30] sm:$0xff] %vm316_vm1, %v306_v31  ;;  %324 = vst.msk [vmem:[#allocation2 + $0x38] sm:$0xff] %vm316_vm1, %v307_v32  ;;  %v313_v44 = vadd.f32 %v297_v41, %v1259_v13  ;;  %v314_v45 = vadd.f32 %v298_v42, %v1261_v14  ;;  %v299_v46 = vld [vmem:[#allocation2 + $0x78] sm:$0xff] }
  0x2c   : > { %325 = vst.msk [vmem:[#allocation2 + $0x40] sm:$0xff] %vm316_vm1, %v308_v33  ;;  %326 = vst.msk [vmem:[#allocation2 + $0x48] sm:$0xff] %vm316_vm1, %v309_v37  ;;  %v315_v47 = vadd.f32 %v299_v46, %v1263_v15 }
  0x2d   : > { %327 = vst.msk [vmem:[#allocation2 + $0x50] sm:$0xff] %vm316_vm1, %v310_v38  ;;  %328 = vst.msk [vmem:[#allocation2 + $0x58] sm:$0xff] %vm316_vm1, %v311_v39 }
  0x2e   : > { %329 = vst.msk [vmem:[#allocation2 + $0x60] sm:$0xff] %vm316_vm1, %v312_v43  ;;  %330 = vst.msk [vmem:[#allocation2 + $0x68] sm:$0xff] %vm316_vm1, %v313_v44 }
  0x2f   : > { %331 = vst.msk [vmem:[#allocation2 + $0x70] sm:$0xff] %vm316_vm1, %v314_v45  ;;  %332 = vst.msk [vmem:[#allocation2 + $0x78] sm:$0xff] %vm316_vm1, %v315_v47 }
  0x30 PF: > { %v349_v48 = vld [vmem:[%s1242_s25] sm:$0xff]  ;;  %vm350_vm2 = vcmask 64512   ;;  %v334_v50 = vld [vmem:[#allocation2 + $0x8] sm:$0xff]  ;;  %v335_v51 = vld [vmem:[#allocation2 + $0x10] sm:$0xff]  ;;  %s720_s9 = sadd.s32 1, %s1226_s16 }
  0x31   : > { %v333_v49 = vld [vmem:[#allocation2] sm:$0xff]  ;;  %1149 = vmatprep.subr.mxu0 %v349_v48  ;;  %1175 = vmatprep.subr.mxu1 %v349_v48  ;;  %v336_v55 = vld [vmem:[#allocation2 + $0x18] sm:$0xff]  ;;  %v338_v59 = vld [vmem:[#allocation2 + $0x28] sm:$0xff]  ;;  %p1127_p6 = scmp.ge.s32.totalorder %s720_s9, 3 }
  0x32   : > { %1151 = vmatprep.mubr.msk.f32.mxu0 %vm350_vm2, %v333_v49  ;;  %1150 = vmatpush3.msra.mxu0 %v349_v48  ;;  %v337_v56 = vld [vmem:[#allocation2 + $0x20] sm:$0xff]  ;;  %v339_v60 = vld [vmem:[#allocation2 + $0x30] sm:$0xff]  ;;  %v340_v63 = vld [vmem:[#allocation2 + $0x38] sm:$0xff] }
  0x33   : > { %1152 = vmatmul.mubr.msk.f32.vlgmr.msra.gmra.mxu0 %vm350_vm2, %v334_v50  ;;  %1176 = vmatpush3.msra.mxu1 %v349_v48  ;;  %v341_v52 = vld [vmem:[#allocation2 + $0x40] sm:$0xff]  ;;  %v342_v53 = vld [vmem:[#allocation2 + $0x48] sm:$0xff] }
  0x34   : > { %v343_v54 = vld [vmem:[#allocation2 + $0x50] sm:$0xff]  ;;  %1154 = vmatprep.mubr.msk.f32.mxu0 %vm350_vm2, %v335_v51  ;;  %1163 = vmatprep.mubr.msk.f32.mxu1 %vm350_vm2, %v341_v52  ;;  %v344_v57 = vld [vmem:[#allocation2 + $0x58] sm:$0xff] }
  0x35   : > { %1164 = vmatmul.mubr.msk.f32.vlgmr.msra.gmra.mxu1 %vm350_vm2, %v342_v53  ;;  %v345_v58 = vld [vmem:[#allocation2 + $0x60] sm:$0xff]  ;;  %v346_v61 = vld [vmem:[#allocation2 + $0x68] sm:$0xff] }
  0x36   : > { %1166 = vmatprep.mubr.msk.f32.mxu1 %vm350_vm2, %v343_v54  ;;  %v347_v62 = vld [vmem:[#allocation2 + $0x70] sm:$0xff]  ;;  %v348_v0 = vld [vmem:[#allocation2 + $0x78] sm:$0xff] }
  0x37   : > { %1155 = vmatmul.mubr.msk.f32.gmra.mxu0 %vm350_vm2, %v336_v55 }
  0x38   : > { %1157 = vmatprep.mubr.msk.f32.mxu0 %vm350_vm2, %v337_v56 }
  0x39   : > { %1167 = vmatmul.mubr.msk.f32.gmra.mxu1 %vm350_vm2, %v344_v57 }
  0x3a   : > { %1169 = vmatprep.mubr.msk.f32.mxu1 %vm350_vm2, %v345_v58 }
  0x3b   : > { %1158 = vmatmul.mubr.msk.f32.gmra.mxu0 %vm350_vm2, %v338_v59 }
  0x3c   : > { %1160 = vmatprep.mubr.msk.f32.mxu0 %vm350_vm2, %v339_v60 }
  0x3d   : > { %1170 = vmatmul.mubr.msk.f32.gmra.mxu1 %vm350_vm2, %v346_v61 }
  0x3e   : > { %1172 = vmatprep.mubr.msk.f32.mxu1 %vm350_vm2, %v347_v62 }
  0x3f   : > { %1161 = vmatmul.mubr.msk.f32.gmra.mxu0 %vm350_vm2, %v340_v63 }
  0x41   : > { %1173 = vmatmul.mubr.msk.f32.gmra.mxu1 %vm350_vm2, %v348_v0 }
  0xf3   : > { %v1153_v1 = vpop.f32.mrf.mxu0 }
  0xf4   : > { %v1325_v2 = vmax.f32 %v1153_v1, 0.0 }
  0xf5   : > { %v465_v3 = vpop.f32.mrf.mxu0  ;;  %v1165_v4 = vpop.f32.mrf.mxu1 }
  0xf6   : > { %v1327_v5 = vmax.f32 %v465_v3, 0.0  ;;  %v599_v8 = vmul.f32 %v1325_v2, %v1325_v2  ;;  %v561_v14 = vsel %vm350_vm2, %v1325_v2, 0.0  ;;  %v1372_v49 = vmax.f32 %v1165_v4, 0.0 }
  0xf7   : > { %v1156_v6 = vpop.f32.mrf.mxu0  ;;  %v505_v7 = vpop.f32.mrf.mxu1 }
  0xf8   : > { %v560_v9 = vsel %vm350_vm2, %v1327_v5, 0.0  ;;  %v598_v10 = vmul.f32 %v1327_v5, %v1327_v5  ;;  %v1335_v11 = vmax.f32 %v1156_v6, 0.0  ;;  %v615_v21 = vsel %vm350_vm2, %v599_v8, 0.0 }
  0xf9   : > { %v475_v12 = vpop.f32.mrf.mxu0  ;;  %v1168_v13 = vpop.f32.mrf.mxu1  ;;  %v562_v17 = vadd.f32 %v561_v14, %v560_v9  ;;  %v1370_v46 = vmax.f32 %v505_v7, 0.0  ;;  %v607_v1 = vmul.f32 %v1372_v49, %v1372_v49  ;;  %v577_v8 = vsel %vm350_vm2, %v1372_v49, 0.0 }
  0xfa   : > { %v614_v15 = vsel %vm350_vm2, %v598_v10, 0.0  ;;  %v1340_v16 = vmax.f32 %v475_v12, 0.0  ;;  %v601_v18 = vmul.f32 %v1335_v11, %v1335_v11  ;;  %v565_v28 = vsel %vm350_vm2, %v1335_v11, 0.0 }
  0xfb   : > { %v1159_v19 = vpop.f32.mrf.mxu0  ;;  %v515_v20 = vpop.f32.mrf.mxu1  ;;  %v616_v25 = vadd.f32 %v615_v21, %v614_v15  ;;  %v606_v59 = vmul.f32 %v1370_v46, %v1370_v46  ;;  %v575_v3 = vsel %vm350_vm2, %v1370_v46, 0.0  ;;  %v1393_v4 = vmax.f32 %v1168_v13, 0.0 }
  0xfc   : > { %v563_v22 = vsel %vm350_vm2, %v1340_v16, 0.0  ;;  %v600_v23 = vmul.f32 %v1340_v16, %v1340_v16  ;;  %v1349_v24 = vmax.f32 %v1159_v19, 0.0  ;;  %v619_v31 = vsel %vm350_vm2, %v601_v18, 0.0 }
  0xfd   : > { %v564_v26 = vadd.f32 %v563_v22, %v562_v17  ;;  %v485_v27 = vpop.f32.mrf.mxu0  ;;  %v1171_v35 = vpop.f32.mrf.mxu1  ;;  %v1386_v60 = vmax.f32 %v515_v20, 0.0  ;;  %v629_v9 = vsel %vm350_vm2, %v606_v59, 0.0  ;;  %v631_v18 = vsel %vm350_vm2, %v607_v1, 0.0 }
  0xfe   : > { %v617_v29 = vsel %vm350_vm2, %v600_v23, 0.0  ;;  %v1354_v30 = vmax.f32 %v485_v27, 0.0  ;;  %v603_v36 = vmul.f32 %v1349_v24, %v1349_v24  ;;  %v569_v43 = vsel %vm350_vm2, %v1349_v24, 0.0 }
  0xff   : > { %v618_v32 = vadd.f32 %v617_v29, %v616_v25  ;;  %v566_v33 = vadd.f32 %v565_v28, %v564_v26  ;;  %v1162_v34 = vpop.f32.mrf.mxu0  ;;  %v525_v50 = vpop.f32.mrf.mxu1  ;;  %v608_v10 = vmul.f32 %v1386_v60, %v1386_v60  ;;  %v609_v13 = vmul.f32 %v1393_v4, %v1393_v4 }
 0x100   : > { %v567_v37 = vsel %vm350_vm2, %v1354_v30, 0.0  ;;  %v602_v38 = vmul.f32 %v1354_v30, %v1354_v30  ;;  %v1363_v39 = vmax.f32 %v1162_v34, 0.0  ;;  %v623_v51 = vsel %vm350_vm2, %v603_v36, 0.0 }
 0x101   : > { %v568_v40 = vadd.f32 %v567_v37, %v566_v33  ;;  %v620_v41 = vadd.f32 %v619_v31, %v618_v32  ;;  %v495_v42 = vpop.f32.mrf.mxu0  ;;  %v1174_v63 = vpop.f32.mrf.mxu1  ;;  %v1400_v12 = vmax.f32 %v525_v50, 0.0  ;;  %v579_v19 = vsel %vm350_vm2, %v1386_v60, 0.0 }
 0x102   : > { %v621_v44 = vsel %vm350_vm2, %v602_v38, 0.0  ;;  %v1368_v45 = vmax.f32 %v495_v42, 0.0  ;;  %v605_v52 = vmul.f32 %v1363_v39, %v1363_v39  ;;  %v573_v57 = vsel %vm350_vm2, %v1363_v39, 0.0 }
 0x103   : > { %v622_v47 = vadd.f32 %v621_v44, %v620_v41  ;;  %v570_v48 = vadd.f32 %v569_v43, %v568_v40  ;;  %v535_v17 = vpop.f32.mrf.mxu1  ;;  %v1407_v20 = vmax.f32 %v1171_v35, 0.0  ;;  %v581_v23 = vsel %vm350_vm2, %v1393_v4, 0.0 }
 0x104   : > { %v571_v53 = vsel %vm350_vm2, %v1368_v45, 0.0  ;;  %v604_v54 = vmul.f32 %v1368_v45, %v1368_v45  ;;  %v627_v0 = vsel %vm350_vm2, %v605_v52, 0.0  ;;  %v633_v25 = vsel %vm350_vm2, %v608_v10, 0.0 }
 0x105   : > { %v572_v55 = vadd.f32 %v571_v53, %v570_v48  ;;  %v624_v56 = vadd.f32 %v623_v51, %v622_v47  ;;  %v610_v26 = vmul.f32 %v1400_v12, %v1400_v12  ;;  %v1414_v27 = vmax.f32 %v535_v17, 0.0 }
 0x106   : > { %v625_v58 = vsel %vm350_vm2, %v604_v54, 0.0  ;;  %v635_v31 = vsel %vm350_vm2, %v609_v13, 0.0  ;;  %v611_v32 = vmul.f32 %v1407_v20, %v1407_v20  ;;  %v583_v33 = vsel %vm350_vm2, %v1400_v12, 0.0 }
 0x107   : > { %v574_v61 = vadd.f32 %v573_v57, %v572_v55  ;;  %v626_v62 = vadd.f32 %v625_v58, %v624_v56  ;;  %v1421_v34 = vmax.f32 %v1174_v63, 0.0  ;;  %v585_v37 = vsel %vm350_vm2, %v1407_v20, 0.0 }
 0x108   : > { %v637_v38 = vsel %vm350_vm2, %v610_v26, 0.0  ;;  %v612_v40 = vmul.f32 %v1414_v27, %v1414_v27  ;;  %v639_v43 = vsel %vm350_vm2, %v611_v32, 0.0  ;;  %v587_v47 = vsel %vm350_vm2, %v1414_v27, 0.0  ;;  %v659_v26 = vld [vmem:[%s237_s5] sm:$0x1] }
 0x109   : > { %v628_v6 = vadd.f32 %v627_v0, %v626_v62  ;;  %v576_v7 = vadd.f32 %v575_v3, %v574_v61  ;;  %v613_v44 = vmul.f32 %v1421_v34, %v1421_v34  ;;  %v589_v51 = vsel %vm350_vm2, %v1421_v34, 0.0 }
 0x10a   : > { %v641_v52 = vsel %vm350_vm2, %v612_v40, 0.0  ;;  %v662_v13 = vlaneseq }
 0x10b   : > { %v630_v14 = vadd.f32 %v629_v9, %v628_v6  ;;  %v578_v15 = vadd.f32 %v577_v8, %v576_v7  ;;  %v643_v55 = vsel %vm350_vm2, %v613_v44, 0.0 }
 0x10d   : > { %v580_v21 = vadd.f32 %v579_v19, %v578_v15  ;;  %v632_v22 = vadd.f32 %v631_v18, %v630_v14  ;;  %v1437_v19 = vshrl.u32 %v662_v13, 7 }
 0x10f   : > { %v634_v28 = vadd.f32 %v633_v25, %v632_v22  ;;  %v582_v29 = vadd.f32 %v581_v23, %v580_v21  ;;  %v657_v21 = vld [vmem:[%s234_s28] sm:$0x1]  ;;  %v664_v22 = vsub.s32 0, %v1437_v19 }
 0x111   : > { %v584_v35 = vadd.f32 %v583_v33, %v582_v29  ;;  %v636_v36 = vadd.f32 %v635_v31, %v634_v28 }
 0x113   : > { %v638_v41 = vadd.f32 %v637_v38, %v636_v36  ;;  %v586_v42 = vadd.f32 %v585_v37, %v584_v35 }
 0x115   : > { %v588_v48 = vadd.f32 %v587_v47, %v586_v42  ;;  %v640_v50 = vadd.f32 %v639_v43, %v638_v41 }
 0x117   : > { %v590_v53 = vadd.f32 %v589_v51, %v588_v48  ;;  %v642_v54 = vadd.f32 %v641_v52, %v640_v50 }
 0x119   : > { %v591_v56 = vrot.slane %v590_v53, 4  ;;  %v644_v57 = vadd.f32 %v643_v55, %v642_v54 }
 0x11b   : > { %v592_v58 = vadd.f32 %v591_v56, %v590_v53  ;;  %v645_v59 = vrot.slane %v644_v57, 4 }
 0x11d   : > { %v593_v61 = vrot.slane %v592_v58, 2  ;;  %v646_v62 = vadd.f32 %v645_v59, %v644_v57 }
 0x11f   : > { %v594_v63 = vadd.f32 %v593_v61, %v592_v58  ;;  %v647_v0 = vrot.slane %v646_v62, 2 }
 0x121   : > { %v595_v1 = vrot.slane %v594_v63, 1  ;;  %v648_v3 = vadd.f32 %v647_v0, %v646_v62 }
 0x123   : > { %v596_v6 = vadd.f32 %v595_v1, %v594_v63  ;;  %v649_v7 = vrot.slane %v648_v3, 1 }
 0x125   : > { %v597_v8 = vmul.f32 0.03125, %v596_v6  ;;  %v650_v9 = vadd.f32 %v649_v7, %v648_v3 }
 0x127   : > { %v651_v10 = vmul.f32 0.03125, %v650_v9  ;;  %v652_v14 = vmul.f32 %v597_v8, %v597_v8 }
 0x129   : > { %v653_v15 = vsub.f32 %v651_v10, %v652_v14 }
 0x12b   : > { %v654_v17 = vmax.f32 %v653_v15, 0.0 }
 0x12d   : > { %v655_v18 = vadd.f32 1e-05, %v654_v17 }
 0x12f   : > { %1185 = vrsqrt.f32 %v655_v18 }
 0x13c   : > { %v1186_v23 = vpop.eup %1185 }
 0x13d   : > { %v658_v25 = vmul.f32 %v1186_v23, %v657_v21 }
 0x13f   : > { %v660_v28 = vmul.f32 %v658_v25, %v597_v8  ;;  %v665_v29 = vrot.slane %v658_v25, %v664_v22 }
 0x141   : > { %v661_v31 = vsub.f32 %v659_v26, %v660_v28  ;;  %v666_v32 = vmul.f32 %v665_v29, %v1327_v5  ;;  %v667_v33 = vmul.f32 %v665_v29, %v1325_v2  ;;  %v668_v35 = vmul.f32 %v665_v29, %v1340_v16 }
 0x142   : > { %v669_v36 = vmul.f32 %v665_v29, %v1335_v11  ;;  %v670_v37 = vmul.f32 %v665_v29, %v1354_v30  ;;  %v671_v38 = vmul.f32 %v665_v29, %v1349_v24  ;;  %v672_v40 = vmul.f32 %v665_v29, %v1368_v45 }
 0x143   : > { %v673_v41 = vmul.f32 %v665_v29, %v1363_v39  ;;  %v674_v42 = vmul.f32 %v665_v29, %v1370_v46  ;;  %v675_v43 = vmul.f32 %v665_v29, %v1372_v49  ;;  %v676_v5 = vmul.f32 %v665_v29, %v1386_v60 }
 0x144   : > { %v677_v2 = vmul.f32 %v665_v29, %v1393_v4  ;;  %v686_v44 = vrot.slane %v661_v31, %v664_v22  ;;  %v678_v16 = vmul.f32 %v665_v29, %v1400_v12  ;;  %v679_v11 = vmul.f32 %v665_v29, %v1407_v20 }
 0x145   : > { %v680_v24 = vmul.f32 %v665_v29, %v1414_v27  ;;  %v681_v30 = vmul.f32 %v665_v29, %v1421_v34 }
 0x146   : > { %v688_v39 = vadd.f32 %v686_v44, %v666_v32  ;;  %v689_v45 = vadd.f32 %v686_v44, %v667_v33  ;;  %v690_v46 = vadd.f32 %v686_v44, %v668_v35  ;;  %v691_v49 = vadd.f32 %v686_v44, %v669_v36 }
 0x147   : > { %v1466_v60 = vadd.f32 %v686_v44, %v670_v37  ;;  %v1468_v4 = vadd.f32 %v686_v44, %v671_v38  ;;  %v1470_v12 = vadd.f32 %v686_v44, %v672_v40  ;;  %v1472_v20 = vadd.f32 %v686_v44, %v673_v41 }
 0x148   : > { %v1474_v27 = vadd.f32 %v686_v44, %v674_v42  ;;  %v1476_v34 = vadd.f32 %v686_v44, %v675_v43  ;;  %v1478_v47 = vadd.f32 %v686_v44, %v676_v5  ;;  %v1480_v48 = vadd.f32 %v686_v44, %v677_v2  ;;  %704 = vst.msk [vmem:[%s1255_s8] sm:$0xff] %vm350_vm2, %v688_v39 }
 0x149   : > { %705 = vst.msk [vmem:[%s1255_s8 + $0x8] sm:$0xff] %vm350_vm2, %v689_v45  ;;  %706 = vst.msk [vmem:[%s1255_s8 + $0x10] sm:$0xff] %vm350_vm2, %v690_v46  ;;  %v1490_v50 = vadd.f32 %v686_v44, %v678_v16  ;;  %v1492_v51 = vadd.f32 %v686_v44, %v679_v11  ;;  %v1494_v52 = vadd.f32 %v686_v44, %v680_v24 }
 0x14a   : > { %707 = vst.msk [vmem:[%s1255_s8 + $0x18] sm:$0xff] %vm350_vm2, %v691_v49  ;;  %v1496_v53 = vadd.f32 %v686_v44, %v681_v30  ;;  %708 = vst.msk [vmem:[%s1255_s8 + $0x20] sm:$0xff] %vm350_vm2, %v1466_v60 }
 0x14b   : > { %709 = vst.msk [vmem:[%s1255_s8 + $0x28] sm:$0xff] %vm350_vm2, %v1468_v4  ;;  %710 = vst.msk [vmem:[%s1255_s8 + $0x30] sm:$0xff] %vm350_vm2, %v1470_v12 }
 0x14c   : > { %711 = vst.msk [vmem:[%s1255_s8 + $0x38] sm:$0xff] %vm350_vm2, %v1472_v20  ;;  %712 = vst.msk [vmem:[%s1255_s8 + $0x40] sm:$0xff] %vm350_vm2, %v1474_v27  ;;  %724 = sbr.rel (%p1127_p6) target bundleno = 355 (0x163), region = 48 }
 0x14d   : > { %713 = vst.msk [vmem:[%s1255_s8 + $0x48] sm:$0xff] %vm350_vm2, %v1476_v34  ;;  %714 = vst.msk [vmem:[%s1255_s8 + $0x50] sm:$0xff] %vm350_vm2, %v1478_v47 }
 0x14e   : > { %715 = vst.msk [vmem:[%s1255_s8 + $0x58] sm:$0xff] %vm350_vm2, %v1480_v48  ;;  %716 = vst.msk [vmem:[%s1255_s8 + $0x60] sm:$0xff] %vm350_vm2, %v1490_v50 }
 0x14f   : > { %717 = vst.msk [vmem:[%s1255_s8 + $0x68] sm:$0xff] %vm350_vm2, %v1492_v51  ;;  %718 = vst.msk [vmem:[%s1255_s8 + $0x70] sm:$0xff] %vm350_vm2, %v1494_v52 }
 0x150   : > { %719 = vst.msk [vmem:[%s1255_s8 + $0x78] sm:$0xff] %vm350_vm2, %v1496_v53 }
 0x151   : > { %v746_v54 = vand.u32 7, %v1437_v19  ;;  %v727_v55 = vadd.s32 8, %v1437_v19  ;;  %v728_v56 = vadd.s32 16, %v1437_v19  ;;  %v729_v57 = vadd.s32 24, %v1437_v19 }
 0x152   : > { %v730_v58 = vadd.s32 32, %v1437_v19  ;;  %v731_v59 = vadd.s32 40, %v1437_v19  ;;  %v732_v61 = vadd.s32 48, %v1437_v19  ;;  %v733_v62 = vadd.s32 56, %v1437_v19 }
 0x153   : > { %vm934_vm3 = vcmp.lt.s32.totalorder %v746_v54, 2  ;;  %v753_v63 = vand.u32 7, %v727_v55  ;;  %v760_v0 = vand.u32 7, %v728_v56  ;;  %v767_v1 = vand.u32 7, %v729_v57 }
 0x154   : > { %v982_v3 = vsel %vm934_vm3, %v688_v39, 0.0  ;;  %v774_v6 = vand.u32 7, %v730_v58  ;;  %v781_v7 = vand.u32 7, %v731_v59  ;;  %v788_v8 = vand.u32 7, %v732_v61 }
 0x155   : > { %998 = vst.msk [vmem:[#allocation2] sm:$0xff] %vm350_vm2, %v982_v3  ;;  %vm935_vm4 = vcmp.lt.s32.totalorder %v753_v63, 2  ;;  %vm936_vm5 = vcmp.lt.s32.totalorder %v760_v0, 2  ;;  %vm937_vm6 = vcmp.lt.s32.totalorder %v767_v1, 2  ;;  %v795_v9 = vand.u32 7, %v733_v62 }
 0x156   : > { %v983_v10 = vsel %vm935_vm4, %v689_v45, 0.0  ;;  %v984_v14 = vsel %vm936_vm5, %v690_v46, 0.0  ;;  %v985_v15 = vsel %vm937_vm6, %v691_v49, 0.0  ;;  %vm938_vm7 = vcmp.lt.s32.totalorder %v774_v6, 2 }
 0x157   : > { %999 = vst.msk [vmem:[#allocation2 + $0x8] sm:$0xff] %vm350_vm2, %v983_v10  ;;  %1000 = vst.msk [vmem:[#allocation2 + $0x10] sm:$0xff] %vm350_vm2, %v984_v14  ;;  %v986_v17 = vsel %vm938_vm7, %v1466_v60, 0.0  ;;  %vm939_vm8 = vcmp.lt.s32.totalorder %v781_v7, 2  ;;  %vm940_vm9 = vcmp.lt.s32.totalorder %v788_v8, 2  ;;  %vm941_vm10 = vcmp.lt.s32.totalorder %v795_v9, 2 }
 0x158   : > { %1001 = vst.msk [vmem:[#allocation2 + $0x18] sm:$0xff] %vm350_vm2, %v985_v15  ;;  %1002 = vst.msk [vmem:[#allocation2 + $0x20] sm:$0xff] %vm350_vm2, %v986_v17  ;;  %v987_v18 = vsel %vm939_vm8, %v1468_v4, 0.0  ;;  %v988_v13 = vsel %vm940_vm9, %v1470_v12, 0.0  ;;  %v989_v21 = vsel %vm941_vm10, %v1472_v20, 0.0  ;;  %v734_v22 = vadd.s32 64, %v1437_v19 }
 0x159   : > { %1003 = vst.msk [vmem:[#allocation2 + $0x28] sm:$0xff] %vm350_vm2, %v987_v18  ;;  %1004 = vst.msk [vmem:[#allocation2 + $0x30] sm:$0xff] %vm350_vm2, %v988_v13  ;;  %v735_v23 = vadd.s32 72, %v1437_v19  ;;  %v736_v25 = vadd.s32 80, %v1437_v19  ;;  %v737_v26 = vadd.s32 88, %v1437_v19  ;;  %v738_v28 = vadd.s32 96, %v1437_v19 }
 0x15a   : > { %1005 = vst.msk [vmem:[#allocation2 + $0x38] sm:$0xff] %vm350_vm2, %v989_v21  ;;  %v802_v29 = vand.u32 7, %v734_v22  ;;  %v739_v31 = vadd.s32 104, %v1437_v19  ;;  %v740_v32 = vadd.s32 112, %v1437_v19  ;;  %v741_v33 = vadd.s32 120, %v1437_v19 }
 0x15b   : > { %v809_v35 = vand.u32 7, %v735_v23  ;;  %v816_v36 = vand.u32 7, %v736_v25  ;;  %v823_v37 = vand.u32 7, %v737_v26  ;;  %v830_v38 = vand.u32 7, %v738_v28 }
 0x15c   : > { %vm942_vm11 = vcmp.lt.s32.totalorder %v802_v29, 2  ;;  %v837_v40 = vand.u32 7, %v739_v31  ;;  %v844_v41 = vand.u32 7, %v740_v32  ;;  %v851_v42 = vand.u32 7, %v741_v33 }
 0x15d   : > { %v990_v43 = vsel %vm942_vm11, %v1474_v27, 0.0  ;;  %vm943_vm12 = vcmp.lt.s32.totalorder %v809_v35, 2  ;;  %vm944_vm13 = vcmp.lt.s32.totalorder %v816_v36, 2  ;;  %vm945_vm14 = vcmp.lt.s32.totalorder %v823_v37, 2 }
 0x15e   : > { %1006 = vst.msk [vmem:[#allocation2 + $0x40] sm:$0xff] %vm350_vm2, %v990_v43  ;;  %v991_v5 = vsel %vm943_vm12, %v1476_v34, 0.0  ;;  %v992_v2 = vsel %vm944_vm13, %v1478_v47, 0.0  ;;  %v993_v19 = vsel %vm945_vm14, %v1480_v48, 0.0  ;;  %vm946_vm15 = vcmp.lt.s32.totalorder %v830_v38, 2 }
 0x15f   : > { %1007 = vst.msk [vmem:[#allocation2 + $0x48] sm:$0xff] %vm350_vm2, %v991_v5  ;;  %1008 = vst.msk [vmem:[#allocation2 + $0x50] sm:$0xff] %vm350_vm2, %v992_v2  ;;  %v994_v44 = vsel %vm946_vm15, %v1490_v50, 0.0  ;;  %vm947_vm0 = vcmp.lt.s32.totalorder %v837_v40, 2  ;;  %vm948_vm1 = vcmp.lt.s32.totalorder %v844_v41, 2  ;;  %vm949_vm3 = vcmp.lt.s32.totalorder %v851_v42, 2 }
 0x160   : > { %1009 = vst.msk [vmem:[#allocation2 + $0x58] sm:$0xff] %vm350_vm2, %v993_v19  ;;  %1010 = vst.msk [vmem:[#allocation2 + $0x60] sm:$0xff] %vm350_vm2, %v994_v44  ;;  %v995_v16 = vsel %vm947_vm0, %v1492_v51, 0.0  ;;  %v996_v11 = vsel %vm948_vm1, %v1494_v52, 0.0  ;;  %v997_v24 = vsel %vm949_vm3, %v1496_v53, 0.0 }
 0x161   : > { %1011 = vst.msk [vmem:[#allocation2 + $0x68] sm:$0xff] %vm350_vm2, %v995_v16  ;;  %1012 = vst.msk [vmem:[#allocation2 + $0x70] sm:$0xff] %vm350_vm2, %v996_v11 }
 0x162   : > { %1013 = vst.msk [vmem:[#allocation2 + $0x78] sm:$0xff] %vm350_vm2, %v997_v24 }
 0x163 PF: > { %s14_s15 = sadd.s32 1, %s1193_s15  }
 0x164   : > { %p11_p7 = scmp.ge.s32.totalorder %s14_s15, 5  }
 0x166   :  { %13 = sbr.rel (!%p11_p7) target bundleno = 1 (0x1), region = 87 }

</bundles_post_ra>
